<compile_context>
chip_gen: v6e
topology: v6e:2x2x1
jax: 0.10.0
libtpu: 0.0.40
codegen_flags: <defaults>
</compile_context>

<pallas_src>
import functools

import jax
import jax.numpy as jnp
from jax.experimental import pallas as pl
from jax.experimental.pallas import tpu as pltpu

OUT_CHANNEL = 111                 # CAN symbol-class count (fixed by the module)
KEEP_LO, KEEP_HI = 2, 106         # gen_counting_label ignores {0,1,107..110}
TN_MAX = 2048                     # token-tile rows (safe on v5e..v7x VMEM)
NUM_SPLITS = 2                    # leading "parallel" axis (one half per v7x TC)
VMEM_LIMIT = 40 * 1024 * 1024


def _cdiv(a, b):
    return -(-a // b)


def _round_up(x, m):
    return ((x + m - 1) // m) * m


def _partial_kernel(wp_ref, lab_ref, hist_ref, ce_ref, *, T, n_inner, tn):
    """Per-tile CE sum + per-batch class histogram (partials per split)."""
    c = pl.program_id(0)          # split (TensorCore) index
    i = pl.program_id(1)          # tile index inside this split

    @pl.when(i == 0)
    def _init():
        hist_ref[...] = jnp.zeros_like(hist_ref)
        ce_ref[...] = jnp.zeros_like(ce_ref)

    logits = wp_ref[...].astype(jnp.float32)        # [tn, C]; cast in-kernel
    lab = lab_ref[...]                              # [tn, 1] int32, -1 on pad rows
    C = logits.shape[-1]
    B = hist_ref.shape[1]

    # One-hot of the labels; padded / out-of-range rows (label == -1) stay zero.
    cls = jax.lax.broadcasted_iota(jnp.int32, (1, C), 1)
    hit = lab == cls                                # [tn, C] bool
    onehot = hit.astype(jnp.bfloat16)               # exact 0/1, MXU-native dtype

    # Cross-entropy sum over valid rows: logsumexp - logit[label].
    m = jnp.max(logits, axis=-1, keepdims=True)
    lse = m + jnp.log(jnp.sum(jnp.exp(logits - m), axis=-1, keepdims=True))
    picked = jnp.sum(jnp.where(hit, logits, 0.0), axis=-1, keepdims=True)
    ce_rows = jnp.where(lab >= 0, lse - picked, 0.0)     # mask padded rows
    ce_ref[...] += jnp.sum(ce_rows)

    # Per-batch histogram on the MXU: sel[b, r] = 1 iff global row r belongs to
    # batch b.  Rows past N (= B*T) select nothing, so padded tiles are inert.
    start = (c * n_inner + i) * tn
    row = start + jax.lax.broadcasted_iota(jnp.int32, (1, tn), 1)    # [1, tn]
    bidx = jax.lax.broadcasted_iota(jnp.int32, (B, 1), 0)            # [B, 1]
    sel = jnp.logical_and(row >= bidx * T, row < (bidx + 1) * T)
    sel = sel.astype(jnp.bfloat16)                                   # [B, tn]
    hist_ref[...] += jnp.dot(sel, onehot,
                             preferred_element_type=jnp.float32)[None]


def _finalize_kernel(hist_ref, ce_ref, cp_ref, cp1_ref, cp2_ref, out_ref,
                     *, n_rows):
    """Combine split partials, apply ignore mask, SmoothL1 + CE mean."""
    S = hist_ref.shape[0]
    hist = hist_ref[0]                               # [B, C]
    ce_sum = ce_ref[0]                               # [1, 1]
    for s in range(1, S):
        hist = hist + hist_ref[s]
        ce_sum = ce_sum + ce_ref[s]

    B, C = hist.shape
    ch = jax.lax.broadcasted_iota(jnp.int32, (B, C), 1)
    keep = jnp.logical_and(ch >= KEEP_LO, ch <= KEEP_HI)
    counting_labels = jnp.where(keep, hist, 0.0)

    inv_bc = 1.0 / float(B * C)

    def smooth_l1(pred):            # SmoothL1Loss(reduction='mean', beta=1.0)
        d = pred.astype(jnp.float32) - counting_labels
        ad = jnp.abs(d)
        return jnp.sum(jnp.where(ad < 1.0, 0.5 * d * d, ad - 0.5)) * inv_bc

    counting_loss = (smooth_l1(cp1_ref[...]) + smooth_l1(cp2_ref[...])
                     + smooth_l1(cp_ref[...]))
    word_loss = ce_sum * (1.0 / float(n_rows))       # CrossEntropy mean, (1, 1)
    out_ref[...] = word_loss + counting_loss


@jax.jit
def can_loss(word_probs, counting_preds, counting_preds1, counting_preds2,
             labels, labels_mask):
    # use_label_mask=False in the reference CANLoss, so labels_mask is unused.
    del labels_mask
    B, T, C = word_probs.shape
    N = B * T
    tn = min(TN_MAX, _round_up(N, 8))
    n_blocks = _cdiv(N, tn)                          # real logits blocks
    n_inner = _cdiv(n_blocks, NUM_SPLITS)            # tiles per split
    n_pad = NUM_SPLITS * n_inner * tn                # rows covered by the grid

    wp = word_probs.reshape(N, C)                    # no padded HBM copy
    lab = jnp.pad(labels.reshape(N, 1).astype(jnp.int32),
                  ((0, n_pad - N), (0, 0)), constant_values=-1)

    kern = functools.partial(_partial_kernel, T=T, n_inner=n_inner, tn=tn)
    itemsize = jnp.dtype(word_probs.dtype).itemsize
    cost = pl.CostEstimate(
        flops=int(10 * N * C + 2 * B * N * C),
        transcendentals=int(N * C + 2 * N),
        bytes_accessed=int(N * C * itemsize + n_pad * 4
                           + NUM_SPLITS * (B * C + 1) * 4))

    hist_parts, ce_parts = pl.pallas_call(
        kern,
        out_shape=(jax.ShapeDtypeStruct((NUM_SPLITS, B, C), jnp.float32),
                   jax.ShapeDtypeStruct((NUM_SPLITS, 1, 1), jnp.float32)),
        grid_spec=pltpu.PrefetchScalarGridSpec(
            num_scalar_prefetch=0,
            grid=(NUM_SPLITS, n_inner),
            in_specs=[
                # Logits tile.  Tiles past the real data are clamped onto the
                # last real block; their rows are masked via labels == -1 and
                # the row >= N batch selector.
                pl.BlockSpec((tn, C),
                             lambda c, i: (jnp.minimum(c * n_inner + i,
                                                       n_blocks - 1), 0)),
                # Labels tile (padded with -1 up to the full grid coverage).
                pl.BlockSpec((tn, 1), lambda c, i: (c * n_inner + i, 0)),
            ],
            out_specs=[
                pl.BlockSpec((1, B, C), lambda c, i: (c, 0, 0)),
                pl.BlockSpec((1, 1, 1), lambda c, i: (c, 0, 0)),
            ]),
        compiler_params=pltpu.CompilerParams(
            dimension_semantics=("parallel", "arbitrary"),
            vmem_limit_bytes=VMEM_LIMIT),
        cost_estimate=cost,
    )(wp, lab)

    out = pl.pallas_call(
        functools.partial(_finalize_kernel, n_rows=N),
        out_shape=jax.ShapeDtypeStruct((1, 1), jnp.float32),
    )(hist_parts, ce_parts, counting_preds, counting_preds1, counting_preds2)

    return {'loss': out[0, 0]}


if __name__ == "__main__":
    key = jax.random.PRNGKey(0)
    B, T, C = 2, 8, OUT_CHANNEL
    k1, k2, k3, k4, k5 = jax.random.split(key, 5)

    word_probs = jax.random.normal(k1, (B, T, C), dtype=jnp.float32)      # preds[0]
    counting_preds = jax.random.uniform(k2, (B, C), dtype=jnp.float32)    # preds[1]
    counting_preds1 = jax.random.uniform(k3, (B, C), dtype=jnp.float32)   # preds[2]
    counting_preds2 = jax.random.uniform(k4, (B, C), dtype=jnp.float32)   # preds[3]
    labels = jax.random.randint(k5, (B, T), 0, C, dtype=jnp.int32)        # batch[2]
    labels_mask = jnp.ones((B, T), dtype=jnp.float32)                     # batch[3]

    result = can_loss(word_probs, counting_preds, counting_preds1,
                      counting_preds2, labels, labels_mask)
    loss = jax.block_until_ready(result['loss'])

    # Pure-JAX reference (same math as the PyTorch module) for a sanity check.
    def ref_loss():
        onehot = jax.nn.one_hot(labels, C, dtype=jnp.float32).sum(axis=1)
        keep = jnp.array([(1.0 if KEEP_LO <= c <= KEEP_HI else 0.0)
                          for c in range(C)], dtype=jnp.float32)
        counting_labels = onehot * keep[None, :]

        def sl1(p):
            d = p - counting_labels
            ad = jnp.abs(d)
            return jnp.mean(jnp.where(ad < 1.0, 0.5 * d * d, ad - 0.5))

        logits = word_probs.reshape(-1, C)
        lse = jax.nn.logsumexp(logits, axis=-1)
        picked = jnp.take_along_axis(logits, labels.reshape(-1, 1), axis=-1)[:, 0]
        word = jnp.mean(lse - picked)
        return word + sl1(counting_preds1) + sl1(counting_preds2) + sl1(counting_preds)

    ref = jax.block_until_ready(ref_loss())
    assert jnp.allclose(loss, ref, rtol=1e-3, atol=1e-3), (loss, ref)
    print("KERNEL_OK")
</pallas_src>

<mosaic_0001>
module attributes {stable_mosaic.version = 11 : i64} {
  func.func @_partial_kernel(%arg0: i32, %arg1: i32, %arg2: memref<16x111xf32, #tpu.memory_space<vmem>>, %arg3: memref<16x1xi32, #tpu.memory_space<vmem>>, %arg4: memref<1x2x111xf32, #tpu.memory_space<vmem>>, %arg5: memref<1x1x1xf32, #tpu.memory_space<vmem>>) attributes {dimension_semantics = [#tpu.dimension_semantics<parallel>, #tpu.dimension_semantics<arbitrary>], iteration_bounds = array<i64: 2, 1>, scalar_prefetch = 0 : i64, scratch_operands = 0 : i64, tpu.core_type = #tpu.core_type<tc>, window_params = [{transform_indices = @transform_0, window_bounds = array<i64: 16, 111>}, {transform_indices = @transform_1, window_bounds = array<i64: 16, 1>}, {transform_indices = @transform_2, window_bounds = array<i64: 1, 2, 111>}, {transform_indices = @transform_3, window_bounds = array<i64: 1, 1, 1>}]} {
    %c0_i32 = arith.constant 0 : i32
    %0 = arith.cmpi eq, %arg1, %c0_i32 : i32
    %1 = arith.extui %0 : i1 to i32
    %c0_i32_0 = arith.constant 0 : i32
    %2 = arith.cmpi ne, %1, %c0_i32_0 : i32
    scf.if %2 {
      %cst_25 = arith.constant 0.000000e+00 : f32
      %66 = vector.broadcast %cst_25 : f32 to vector<1x2x111xf32>
      %c0_26 = arith.constant 0 : index
      %c0_27 = arith.constant 0 : index
      %c0_28 = arith.constant 0 : index
      %67 = vector.load %arg4[%c0_26, %c0_27, %c0_28] : memref<1x2x111xf32, #tpu.memory_space<vmem>>, vector<1x2x111xf32>
      tpu.vector_store %arg4[%c0_26, %c0_27, %c0_28], %66 {strides = array<i32>} : memref<1x2x111xf32, #tpu.memory_space<vmem>>, vector<1x2x111xf32>,
      %cst_29 = arith.constant 0.000000e+00 : f32
      %68 = vector.broadcast %cst_29 : f32 to vector<1x1x1xf32>
      %c0_30 = arith.constant 0 : index
      %c0_31 = arith.constant 0 : index
      %c0_32 = arith.constant 0 : index
      %69 = vector.load %arg5[%c0_30, %c0_31, %c0_32] : memref<1x1x1xf32, #tpu.memory_space<vmem>>, vector<1x1x1xf32>
      tpu.vector_store %arg5[%c0_30, %c0_31, %c0_32], %68 {strides = array<i32>} : memref<1x1x1xf32, #tpu.memory_space<vmem>>, vector<1x1x1xf32>,
    } else {
    }
    %c0 = arith.constant 0 : index
    %c0_1 = arith.constant 0 : index
    %3 = vector.load %arg2[%c0, %c0_1] : memref<16x111xf32, #tpu.memory_space<vmem>>, vector<16x111xf32>
    %c0_2 = arith.constant 0 : index
    %c0_3 = arith.constant 0 : index
    %4 = vector.load %arg3[%c0_2, %c0_3] : memref<16x1xi32, #tpu.memory_space<vmem>>, vector<16x1xi32>
    %5 = tpu.iota {dimensions = array<i32: 1>} : vector<1x111xi32>
    %6 = vector.broadcast %4 : vector<16x1xi32> to vector<16x111xi32>
    %7 = vector.broadcast %5 : vector<1x111xi32> to vector<16x111xi32>
    %8 = arith.cmpi eq, %6, %7 : vector<16x111xi32>
    %9 = arith.extui %8 : vector<16x111xi1> to vector<16x111xi32>
    %10 = arith.sitofp %9 : vector<16x111xi32> to vector<16x111xf32>
    %11 = arith.truncf %10 : vector<16x111xf32> to vector<16x111xbf16>
    %cst = arith.constant dense<0xFF800000> : vector<16xf32>
    %12 = vector.multi_reduction <maximumf>, %3, %cst [1] : vector<16x111xf32> to vector<16xf32>
    %13 = vector.shape_cast %12 : vector<16xf32> to vector<16x1xf32>
    %14 = vector.broadcast %13 : vector<16x1xf32> to vector<16x111xf32>
    %15 = arith.subf %3, %14 : vector<16x111xf32>
    %16 = math.exp %15 : vector<16x111xf32>
    %cst_4 = arith.constant dense<0.000000e+00> : vector<16xf32>
    %17 = vector.multi_reduction <add>, %16, %cst_4 [1] : vector<16x111xf32> to vector<16xf32>
    %18 = vector.shape_cast %17 : vector<16xf32> to vector<16x1xf32>
    %19 = math.log %18 : vector<16x1xf32>
    %20 = arith.addf %13, %19 : vector<16x1xf32>
    %cst_5 = arith.constant 0.000000e+00 : f32
    %21 = vector.broadcast %cst_5 : f32 to vector<16x111xf32>
    %22 = arith.select %8, %3, %21 : vector<16x111xi1>, vector<16x111xf32>
    %cst_6 = arith.constant dense<0.000000e+00> : vector<16xf32>
    %23 = vector.multi_reduction <add>, %22, %cst_6 [1] : vector<16x111xf32> to vector<16xf32>
    %24 = vector.shape_cast %23 : vector<16xf32> to vector<16x1xf32>
    %c0_i32_7 = arith.constant 0 : i32
    %25 = vector.broadcast %c0_i32_7 : i32 to vector<16x1xi32>
    %26 = arith.cmpi sge, %4, %25 : vector<16x1xi32>
    %27 = arith.subf %20, %24 : vector<16x1xf32>
    %cst_8 = arith.constant 0.000000e+00 : f32
    %28 = vector.broadcast %cst_8 : f32 to vector<16x1xf32>
    %29 = arith.select %26, %27, %28 : vector<16x1xi1>, vector<16x1xf32>
    %c0_9 = arith.constant 0 : index
    %c0_10 = arith.constant 0 : index
    %c0_11 = arith.constant 0 : index
    %30 = vector.load %arg5[%c0_9, %c0_10, %c0_11] : memref<1x1x1xf32, #tpu.memory_space<vmem>>, vector<1x1x1xf32>
    %31 = vector.shape_cast %29 : vector<16x1xf32> to vector<1x16x1xf32>
    %cst_12 = arith.constant dense<0.000000e+00> : vector<1xf32>
    %32 = vector.multi_reduction <add>, %31, %cst_12 [1, 2] : vector<1x16x1xf32> to vector<1xf32>
    %33 = vector.shape_cast %32 : vector<1xf32> to vector<1x1x1xf32>
    %34 = vector.extract %33[0, 0, 0] : f32 from vector<1x1x1xf32>
    %35 = vector.broadcast %34 : f32 to vector<1x1x1xf32>
    %36 = arith.addf %30, %35 : vector<1x1x1xf32>
    %c0_13 = arith.constant 0 : index
    %c0_14 = arith.constant 0 : index
    %c0_15 = arith.constant 0 : index
    %37 = vector.load %arg5[%c0_13, %c0_14, %c0_15] : memref<1x1x1xf32, #tpu.memory_space<vmem>>, vector<1x1x1xf32>
    tpu.vector_store %arg5[%c0_13, %c0_14, %c0_15], %36 {strides = array<i32>} : memref<1x1x1xf32, #tpu.memory_space<vmem>>, vector<1x1x1xf32>,
    %c1_i32 = arith.constant 1 : i32
    %38 = arith.muli %arg0, %c1_i32 : i32
    %39 = arith.addi %38, %arg1 : i32
    %c16_i32 = arith.constant 16 : i32
    %40 = arith.muli %39, %c16_i32 : i32
    %41 = tpu.iota {dimensions = array<i32: 1>} : vector<1x16xi32>
    %42 = vector.broadcast %40 : i32 to vector<1x16xi32>
    %43 = arith.addi %42, %41 : vector<1x16xi32>
    %44 = tpu.iota {dimensions = array<i32: 0>} : vector<2x1xi32>
    %c8_i32 = arith.constant 8 : i32
    %45 = vector.broadcast %c8_i32 : i32 to vector<2x1xi32>
    %46 = arith.muli %44, %45 : vector<2x1xi32>
    %47 = vector.broadcast %43 : vector<1x16xi32> to vector<2x16xi32>
    %48 = vector.broadcast %46 : vector<2x1xi32> to vector<2x16xi32>
    %49 = arith.cmpi sge, %47, %48 : vector<2x16xi32>
    %c1_i32_16 = arith.constant 1 : i32
    %50 = vector.broadcast %c1_i32_16 : i32 to vector<2x1xi32>
    %51 = arith.addi %44, %50 : vector<2x1xi32>
    %c8_i32_17 = arith.constant 8 : i32
    %52 = vector.broadcast %c8_i32_17 : i32 to vector<2x1xi32>
    %53 = arith.muli %51, %52 : vector<2x1xi32>
    %54 = vector.broadcast %43 : vector<1x16xi32> to vector<2x16xi32>
    %55 = vector.broadcast %53 : vector<2x1xi32> to vector<2x16xi32>
    %56 = arith.cmpi slt, %54, %55 : vector<2x16xi32>
    %57 = arith.andi %49, %56 : vector<2x16xi1>
    %58 = arith.extui %57 : vector<2x16xi1> to vector<2x16xi32>
    %59 = arith.sitofp %58 : vector<2x16xi32> to vector<2x16xf32>
    %60 = arith.truncf %59 : vector<2x16xf32> to vector<2x16xbf16>
    %c0_18 = arith.constant 0 : index
    %c0_19 = arith.constant 0 : index
    %c0_20 = arith.constant 0 : index
    %61 = vector.load %arg4[%c0_18, %c0_19, %c0_20] : memref<1x2x111xf32, #tpu.memory_space<vmem>>, vector<1x2x111xf32>
    %cst_21 = arith.constant dense<0.000000e+00> : vector<2x111xf32>
    %62 = tpu.matmul %60, %11, %cst_21 {dimension_numbers = #tpu.dot_dimension_numbers<[1], [0], [0], [1], [0, 0, 1, 1], [], []>} : vector<2x16xbf16>, vector<16x111xbf16>, vector<2x111xf32> -> vector<2x111xf32>
    %63 = vector.shape_cast %62 : vector<2x111xf32> to vector<1x2x111xf32>
    %64 = arith.addf %61, %63 : vector<1x2x111xf32>
    %c0_22 = arith.constant 0 : index
    %c0_23 = arith.constant 0 : index
    %c0_24 = arith.constant 0 : index
    %65 = vector.load %arg4[%c0_22, %c0_23, %c0_24] : memref<1x2x111xf32, #tpu.memory_space<vmem>>, vector<1x2x111xf32>
    tpu.vector_store %arg4[%c0_22, %c0_23, %c0_24], %64 {strides = array<i32>} : memref<1x2x111xf32, #tpu.memory_space<vmem>>, vector<1x2x111xf32>,
    return
  }
  func.func @transform_0(%arg0: i32, %arg1: i32) -> (i32, i32) {
    %c1_i32 = arith.constant 1 : i32
    %0 = arith.muli %arg0, %c1_i32 : i32
    %1 = arith.addi %0, %arg1 : i32
    %c0_i32 = arith.constant 0 : i32
    %2 = arith.minsi %1, %c0_i32 : i32
    %c0_i32_0 = arith.constant 0 : i32
    %c0_i32_1 = arith.constant 0 : i32
    return %2, %c0_i32_0 : i32, i32
  }
  func.func @transform_1(%arg0: i32, %arg1: i32) -> (i32, i32) {
    %c1_i32 = arith.constant 1 : i32
    %0 = arith.muli %arg0, %c1_i32 : i32
    %1 = arith.addi %0, %arg1 : i32
    %c0_i32 = arith.constant 0 : i32
    %c0_i32_0 = arith.constant 0 : i32
    return %1, %c0_i32 : i32, i32
  }
  func.func @transform_2(%arg0: i32, %arg1: i32) -> (i32, i32, i32) {
    %c0_i32 = arith.constant 0 : i32
    %c0_i32_0 = arith.constant 0 : i32
    %c0_i32_1 = arith.constant 0 : i32
    return %arg0, %c0_i32, %c0_i32_0 : i32, i32, i32
  }
  func.func @transform_3(%arg0: i32, %arg1: i32) -> (i32, i32, i32) {
    %c0_i32 = arith.constant 0 : i32
    %c0_i32_0 = arith.constant 0 : i32
    %c0_i32_1 = arith.constant 0 : i32
    return %arg0, %c0_i32, %c0_i32_0 : i32, i32, i32
  }
}

module attributes {stable_mosaic.version = 11 : i64} {
  func.func @_finalize_kernel(%arg0: memref<2x2x111xf32, #tpu.memory_space<vmem>>, %arg1: memref<2x1x1xf32, #tpu.memory_space<vmem>>, %arg2: memref<2x111xf32, #tpu.memory_space<vmem>>, %arg3: memref<2x111xf32, #tpu.memory_space<vmem>>, %arg4: memref<2x111xf32, #tpu.memory_space<vmem>>, %arg5: memref<1x1xf32, #tpu.memory_space<vmem>>) attributes {dimension_semantics = [], scalar_prefetch = 0 : i64, scratch_operands = 0 : i64, tpu.core_type = #tpu.core_type<tc>} {
    %c0 = arith.constant 0 : index
    %c0_0 = arith.constant 0 : index
    %c0_1 = arith.constant 0 : index
    %0 = vector.load %arg0[%c0, %c0_0, %c0_1] : memref<2x2x111xf32, #tpu.memory_space<vmem>>, vector<1x2x111xf32>
    %1 = vector.shape_cast %0 : vector<1x2x111xf32> to vector<2x111xf32>
    %c0_2 = arith.constant 0 : index
    %c0_3 = arith.constant 0 : index
    %c0_4 = arith.constant 0 : index
    %2 = vector.load %arg1[%c0_2, %c0_3, %c0_4] : memref<2x1x1xf32, #tpu.memory_space<vmem>>, vector<1x1x1xf32>
    %3 = vector.shape_cast %2 : vector<1x1x1xf32> to vector<1x1xf32>
    %c1 = arith.constant 1 : index
    %c0_5 = arith.constant 0 : index
    %c0_6 = arith.constant 0 : index
    %4 = vector.load %arg0[%c1, %c0_5, %c0_6] : memref<2x2x111xf32, #tpu.memory_space<vmem>>, vector<1x2x111xf32>
    %5 = vector.shape_cast %4 : vector<1x2x111xf32> to vector<2x111xf32>
    %6 = arith.addf %1, %5 : vector<2x111xf32>
    %c1_7 = arith.constant 1 : index
    %c0_8 = arith.constant 0 : index
    %c0_9 = arith.constant 0 : index
    %7 = vector.load %arg1[%c1_7, %c0_8, %c0_9] : memref<2x1x1xf32, #tpu.memory_space<vmem>>, vector<1x1x1xf32>
    %8 = vector.shape_cast %7 : vector<1x1x1xf32> to vector<1x1xf32>
    %9 = arith.addf %3, %8 : vector<1x1xf32>
    %10 = tpu.iota {dimensions = array<i32: 1>} : vector<2x111xi32>
    %c2_i32 = arith.constant 2 : i32
    %11 = vector.broadcast %c2_i32 : i32 to vector<2x111xi32>
    %12 = arith.cmpi sge, %10, %11 : vector<2x111xi32>
    %c106_i32 = arith.constant 106 : i32
    %13 = vector.broadcast %c106_i32 : i32 to vector<2x111xi32>
    %14 = arith.cmpi sle, %10, %13 : vector<2x111xi32>
    %15 = arith.andi %12, %14 : vector<2x111xi1>
    %cst = arith.constant 0.000000e+00 : f32
    %16 = vector.broadcast %cst : f32 to vector<2x111xf32>
    %17 = arith.select %15, %6, %16 : vector<2x111xi1>, vector<2x111xf32>
    %c0_10 = arith.constant 0 : index
    %c0_11 = arith.constant 0 : index
    %18 = vector.load %arg3[%c0_10, %c0_11] : memref<2x111xf32, #tpu.memory_space<vmem>>, vector<2x111xf32>
    %19 = arith.subf %18, %17 : vector<2x111xf32>
    %20 = math.absf %19 : vector<2x111xf32>
    %cst_12 = arith.constant 1.000000e+00 : f32
    %21 = vector.broadcast %cst_12 : f32 to vector<2x111xf32>
    %22 = arith.cmpf olt, %20, %21 : vector<2x111xf32>
    %cst_13 = arith.constant 5.000000e-01 : f32
    %23 = vector.broadcast %cst_13 : f32 to vector<2x111xf32>
    %24 = arith.mulf %23, %19 : vector<2x111xf32>
    %25 = arith.mulf %24, %19 : vector<2x111xf32>
    %cst_14 = arith.constant 5.000000e-01 : f32
    %26 = vector.broadcast %cst_14 : f32 to vector<2x111xf32>
    %27 = arith.subf %20, %26 : vector<2x111xf32>
    %28 = arith.select %22, %25, %27 : vector<2x111xi1>, vector<2x111xf32>
    %29 = vector.shape_cast %28 : vector<2x111xf32> to vector<1x2x111xf32>
    %cst_15 = arith.constant dense<0.000000e+00> : vector<1xf32>
    %30 = vector.multi_reduction <add>, %29, %cst_15 [1, 2] : vector<1x2x111xf32> to vector<1xf32>
    %31 = vector.shape_cast %30 : vector<1xf32> to vector<1x1x1xf32>
    %32 = vector.extract %31[0, 0, 0] : f32 from vector<1x1x1xf32>
    %cst_16 = arith.constant 0.00450450461 : f32
    %33 = arith.mulf %32, %cst_16 : f32
    %c0_17 = arith.constant 0 : index
    %c0_18 = arith.constant 0 : index
    %34 = vector.load %arg4[%c0_17, %c0_18] : memref<2x111xf32, #tpu.memory_space<vmem>>, vector<2x111xf32>
    %35 = arith.subf %34, %17 : vector<2x111xf32>
    %36 = math.absf %35 : vector<2x111xf32>
    %cst_19 = arith.constant 1.000000e+00 : f32
    %37 = vector.broadcast %cst_19 : f32 to vector<2x111xf32>
    %38 = arith.cmpf olt, %36, %37 : vector<2x111xf32>
    %cst_20 = arith.constant 5.000000e-01 : f32
    %39 = vector.broadcast %cst_20 : f32 to vector<2x111xf32>
    %40 = arith.mulf %39, %35 : vector<2x111xf32>
    %41 = arith.mulf %40, %35 : vector<2x111xf32>
    %cst_21 = arith.constant 5.000000e-01 : f32
    %42 = vector.broadcast %cst_21 : f32 to vector<2x111xf32>
    %43 = arith.subf %36, %42 : vector<2x111xf32>
    %44 = arith.select %38, %41, %43 : vector<2x111xi1>, vector<2x111xf32>
    %45 = vector.shape_cast %44 : vector<2x111xf32> to vector<1x2x111xf32>
    %cst_22 = arith.constant dense<0.000000e+00> : vector<1xf32>
    %46 = vector.multi_reduction <add>, %45, %cst_22 [1, 2] : vector<1x2x111xf32> to vector<1xf32>
    %47 = vector.shape_cast %46 : vector<1xf32> to vector<1x1x1xf32>
    %48 = vector.extract %47[0, 0, 0] : f32 from vector<1x1x1xf32>
    %cst_23 = arith.constant 0.00450450461 : f32
    %49 = arith.mulf %48, %cst_23 : f32
    %50 = arith.addf %33, %49 : f32
    %c0_24 = arith.constant 0 : index
    %c0_25 = arith.constant 0 : index
    %51 = vector.load %arg2[%c0_24, %c0_25] : memref<2x111xf32, #tpu.memory_space<vmem>>, vector<2x111xf32>
    %52 = arith.subf %51, %17 : vector<2x111xf32>
    %53 = math.absf %52 : vector<2x111xf32>
    %cst_26 = arith.constant 1.000000e+00 : f32
    %54 = vector.broadcast %cst_26 : f32 to vector<2x111xf32>
    %55 = arith.cmpf olt, %53, %54 : vector<2x111xf32>
    %cst_27 = arith.constant 5.000000e-01 : f32
    %56 = vector.broadcast %cst_27 : f32 to vector<2x111xf32>
    %57 = arith.mulf %56, %52 : vector<2x111xf32>
    %58 = arith.mulf %57, %52 : vector<2x111xf32>
    %cst_28 = arith.constant 5.000000e-01 : f32
    %59 = vector.broadcast %cst_28 : f32 to vector<2x111xf32>
    %60 = arith.subf %53, %59 : vector<2x111xf32>
    %61 = arith.select %55, %58, %60 : vector<2x111xi1>, vector<2x111xf32>
    %62 = vector.shape_cast %61 : vector<2x111xf32> to vector<1x2x111xf32>
    %cst_29 = arith.constant dense<0.000000e+00> : vector<1xf32>
    %63 = vector.multi_reduction <add>, %62, %cst_29 [1, 2] : vector<1x2x111xf32> to vector<1xf32>
    %64 = vector.shape_cast %63 : vector<1xf32> to vector<1x1x1xf32>
    %65 = vector.extract %64[0, 0, 0] : f32 from vector<1x1x1xf32>
    %cst_30 = arith.constant 0.00450450461 : f32
    %66 = arith.mulf %65, %cst_30 : f32
    %67 = arith.addf %50, %66 : f32
    %cst_31 = arith.constant 6.250000e-02 : f32
    %68 = vector.broadcast %cst_31 : f32 to vector<1x1xf32>
    %69 = arith.mulf %9, %68 : vector<1x1xf32>
    %70 = vector.broadcast %67 : f32 to vector<1x1xf32>
    %71 = arith.addf %69, %70 : vector<1x1xf32>
    %c0_32 = arith.constant 0 : index
    %c0_33 = arith.constant 0 : index
    %72 = vector.load %arg5[%c0_32, %c0_33] : memref<1x1xf32, #tpu.memory_space<vmem>>, vector<1x1xf32>
    tpu.vector_store %arg5[%c0_32, %c0_33], %71 {strides = array<i32>} : memref<1x1xf32, #tpu.memory_space<vmem>>, vector<1x1xf32>,
    return
  }
}

</mosaic_0001>

<bundles_post_ra>
// kernel: can_loss.2
= control target key start
LH: loop header
LB: loop body
LE: loop exit
PB: predicated region body
PF: predicated region fallthrough
CT: control target
= control target key end

     0   :  { %s603_s12 = smov 0   ;;  %s605_s13 = smov 0   ;;  %s673_s0 = inlined_call_operand.vmem [shape: f32[16,111], index: 0, kind: input, shape index: {}]   ;;  %s674_s1 = inlined_call_operand.vmem [shape: s32[32,1], index: 1, kind: input, shape index: {}]   ;;  %s675_s2 = inlined_call_operand.vmem [shape: f32[2,2,111], index: 2, kind: output, shape index: {0}]   ;;  %s676_s3 = inlined_call_operand.vmem [shape: f32[2,1,1], index: 3, kind: output, shape index: {1}]  }
   0x1   :  { %s607_s14 = smov 0  }
   0x2 LB: > { %s26_s15 = sadd.s32 1, %s573_s13  ;;  %p492_p0 = scmp.ge.s32.totalorder %s577_s14, 1  ;;  %s577_s14 = sphi %s607_s14, %s14_s14   ;;  %s573_s13 = sphi %s605_s13, %s678_s13   ;;  %s569_s12 = sphi %s603_s12, %s677_s12  }
   0x3   : > { %p28_p1 = scmp.ge.s32.totalorder %s26_s15, 2  ;;  %p180_p2 = scmp.lt.s32.totalorder %s577_s14, 3 }
   0x5   : > { %s680_s15 = smov (%p28_p1, %s26_s15), 0  ;;  %p181_p3 = pnand %p492_p0, %p180_p2 }
   0x6   : > { %p216_p4 = scmp.lt.s32.totalorder (!%p181_p3), %s569_s12, 0  ;;  %s495_s16 = sshll.u32 (!%p181_p3), %s569_s12, 1 }
   0x7   : > { %184 = sbr.rel (%p181_p3) target bundleno = 549 (0x225), region = 28  ;;  %p229_p5 = scmp.lt.s32.totalorder (!%p181_p3), %s495_s16, 3 }
   0x8   : > { %s500_s27 = sshll.u32 (!%p181_p3), %s569_s12, 4  ;;  %p235_p7 = scmp.lt.s32.totalorder (!%p181_p3), %s569_s12, 1 }
   0xc   : > { %v579_v0 = vmov 0   ;;  %s217_s17 = scalar_select %p216_p4, %s569_s12, 0  ;;  %vm270_vm0 = vcmask 908288   ;;  %v580_v7 = vmov 0.0   ;;  %v255_v8 = vlaneseq }
   0xd   : > { %545 = vset.pattern.permute.xlu1 %v579_v0  ;;  %546 = vset.pattern.permute.xlu0 %v579_v0  ;;  %s682_s16 = smov (!%p229_p5, %s495_s16), 3  ;;  %v581_v12 = vmov 1.0|1.0   ;;  %v329_v29 = vstv %s500_s27  ;;  %vm343_vm7 = vcmask 130048   ;;  %vm582_vm8 = vmmov 0   ;;  %s686_s12 = smov (!%p235_p7, %s569_s12), 1 }
   0xe   : > { %s493_s18 = sshll.u32 %s217_s17, 1  ;;  %s496_s19 = sshll.u32 %s682_s16, 3  ;;  %509 = vmatprep.subr.bf16.mxu0 %v580_v7  ;;  %v256_v10 = vand.u32 127, %v255_v8  ;;  %v332_v27 = vshrl.u32 %v255_v8, 7  ;;  %511 = vmatprep.mubr.msk.bf16.mxu0 %vm582_vm8, %v580_v7  ;;  %vm310_vm11 = vcmask 7168   ;;  %vm249_vm12 = vcmask 0  }
   0xf   : > { %p219_p6 = scmp.lt.s32.totalorder %s493_s18, 1  ;;  %s232_s22 = scalar_lea.vmem %s674_s1, %s496_s19  ;;  %vm247_vm13 = vcmask 902144  }
  0x10   : > { %v629_v1 = vld [vmem:[%s232_s22] sm:$0xff]  ;;  %v632_v2 = vld [vmem:[%s232_s22 + $0x8] sm:$0xff]  ;;  %v335_v28 = vadd.s32 1, %v332_v27  ;;  %v330_v30 = vadd.s32 %v329_v29, %v256_v10  ;;  %v333_v31 = vmul.u32 8, %v332_v27  ;;  %s497_s28 = sshll.u32 %s686_s12, 1  ;;  %s241_s4 = scalar_lea.vmem %s676_s3, %s686_s12 }
  0x11   : > { %s684_s18 = smov (!%p219_p6, %s493_s18), 1  ;;  %258 = vperm.xlu1 %545, %v629_v1   ;;  %vm303_vm9 = vcmp.ge.s32.totalorder %v629_v1, 0  ;;  %vm304_vm10 = vcmp.ge.s32.totalorder %v632_v2, 0  ;;  %s238_s7 = scalar_lea.vmem %s675_s2, %s497_s28  ;;  %250 = vst.msk [vmem:[%s241_s4] sm:$0x1] %vm249_vm12, %v580_v7 }
  0x12   : > { %s494_s23 = sshll.u32 %s684_s18, 3  ;;  %v336_v32 = vmul.u32 8, %v335_v28  ;;  %vm334_vm4 = vcmp.ge.s32.totalorder %v330_v30, %v333_v31  ;;  %248 = vst.msk [vmem:[%s238_s7] sm:$0x3] %vm247_vm13, %v580_v7 }
  0x13   : > { %s222_s26 = scalar_lea.vmem %s673_s0, %s494_s23 }
  0x14   : > { %v251_v3 = vld [vmem:[%s222_s26] sm:$0xff]  ;;  %v252_v4 = vld [vmem:[%s222_s26 + $0x8] sm:$0xff]  ;;  %vm337_vm5 = vcmp.lt.s32.totalorder %v330_v30, %v336_v32 }
  0x15   : > { %v271_v5 = vsel %vm270_vm0, %v251_v3, -inf  ;;  %261 = vperm.xlu1 %545, %v632_v2   ;;  %v274_v6 = vsel %vm270_vm0, %v252_v4, -inf  ;;  %vm338_vm6 = vmand %vm334_vm4, %vm337_vm5 }
  0x16   : > { %272 = vmax.xlane.f32.xlu0 %v271_v5  ;;  %v501_v33 = vsel %vm338_vm6, 1.0, %v580_v7 }
  0x17   : > { %v341_v34 = vpack.c.bf16 %v501_v33, %v501_v33 }
  0x18   : > { %v309_v1 = vld [vmem:[%s241_s4] sm:$0x1] }
  0x19   : > { %v342_v52 = vld [vmem:[%s238_s7] sm:$0x3] }
  0x1a   : > { %275 = vmax.xlane.f32.xlu0 %v274_v6 }
  0x8c   : > { %v259_v9 = vpop.permute.xlu1 %258 }
  0x8d   : > { %vm263_vm1 = vcmp.eq.s32.totalorder %v259_v9, %v256_v10 }
  0x8e   : > { %v295_v20 = vsel %vm263_vm1, %v251_v3, 0.0 }
  0x8f   : > { %v297_v22 = vsel %vm270_vm0, %v295_v20, 0.0 }
  0x90   : > { %v262_v11 = vpop.permute.xlu1 %261 }
  0x91   : > { %vm264_vm2 = vcmp.eq.s32.totalorder %v262_v11, %v256_v10 }
  0x92   : > { %vm502_vm3 = vmpackc.low %vm264_vm2, %vm263_vm1  ;;  %v296_v24 = vsel %vm264_vm2, %v252_v4, 0.0 }
  0x93   : > { %510 = vmatpush3.bf16.msk.msra.mxu0 %vm502_vm3, %v581_v12  ;;  %v300_v26 = vsel %vm270_vm0, %v296_v24, 0.0 }
  0x96   : > { %512 = vmatmul.mubr.msk.bf16.vlgmr.msra.gmra.mxu0 %vm343_vm7, %v341_v34 }
  0x9f   : > { %v273_v13 = vpop.xlane.xlu0 %272 }
  0xa0   : > { %v277_v14 = vsub.f32 %v251_v3, %v273_v13 }
  0xa2   : > { %v279_v15 = vmul.f32 1.442695, %v277_v14 }
  0xa3   : > { %v276_v16 = vpop.xlane.xlu0 %275 }
  0xa4   : > { %547 = vpow2.f32 %v279_v15  ;;  %v278_v17 = vsub.f32 %v252_v4, %v276_v16 }
  0xa6   : > { %v281_v18 = vmul.f32 1.442695, %v278_v17 }
  0xa8   : > { %549 = vpow2.f32 %v281_v18 }
  0xb1   : > { %v548_v19 = vpop.eup %547 }
  0xb2   : > { %v283_v21 = vsel %vm270_vm0, %v548_v19, 0.0 }
  0xb3   : > { %284 = vadd.xlane.f32.xlu0 %v283_v21 }
  0xb5   : > { %v550_v23 = vpop.eup %549 }
  0xb6   : > { %v286_v25 = vsel %vm270_vm0, %v550_v23, 0.0 }
  0xb7   : > { %287 = vadd.xlane.f32.xlu1 %v286_v25  ;;  %298 = vadd.xlane.f32.xlu0 %v297_v22 }
  0xbb   : > { %301 = vadd.xlane.f32.xlu0 %v300_v26 }
 0x13c   : > { %v285_v35 = vpop.xlane.xlu0 %284 }
 0x13d   : > { %551 = vlog2.f32 %v285_v35 }
 0x140   : > { %v288_v36 = vpop.xlane.xlu1 %287  ;;  %v299_v39 = vpop.xlane.xlu0 %298 }
 0x141   : > { %553 = vlog2.f32 %v288_v36 }
 0x144   : > { %v302_v45 = vpop.xlane.xlu0 %301 }
 0x14a   : > { %v552_v37 = vpop.eup %551 }
 0x14b   : > { %v290_v38 = vmul.f32 0.6931472, %v552_v37 }
 0x14d   : > { %v293_v40 = vadd.f32 %v290_v38, %v273_v13 }
 0x14e   : > { %v554_v41 = vpop.eup %553 }
 0x14f   : > { %v292_v42 = vmul.f32 0.6931472, %v554_v41  ;;  %v305_v43 = vsub.f32 %v293_v40, %v299_v39 }
 0x151   : > { %v294_v44 = vadd.f32 %v292_v42, %v276_v16  ;;  %v307_v46 = vsel %vm303_vm9, %v305_v43, 0.0 }
 0x152   : > { %v311_v49 = vsel %vm310_vm11, %v307_v46, 0.0 }
 0x153   : > { %v306_v47 = vsub.f32 %v294_v44, %v302_v45 }
 0x155   : > { %v308_v48 = vsel %vm304_vm10, %v306_v47, 0.0 }
 0x156   : > { %v312_v50 = vsel %vm310_vm11, %v308_v48, 0.0  ;;  %v381_v53 = vpop.f32.mrf.mxu0 }
 0x157   : > { %v313_v51 = vadd.f32 %v312_v50, %v311_v49  ;;  %v387_v54 = vadd.f32 %v381_v53, %v342_v52 }
 0x158   : > { %v513_v55 = vpop.f32.mrf.mxu0 }
 0x159   : > { %314 = vadd.xlane.f32.xlu0 %v313_v51  ;;  %389 = vst.msk [vmem:[%s238_s7] sm:$0x3] %vm247_vm13, %v387_v54 }
 0x15a   : > { %v384_v56 = vpop.f32.mrf.mxu0 }
 0x15c   : > { %v514_v57 = vpop.f32.mrf.mxu0 }
 0x1e2   : > { %v315_v58 = vpop.xlane.xlu0 %314 }
 0x1e3   : > { %v316_v59 = vrot.slane %v315_v58, 4 }
 0x1e5   : > { %v317_v60 = vadd.f32 %v316_v59, %v315_v58 }
 0x1e7   : > { %v318_v61 = vrot.slane %v317_v60, 2 }
 0x1e9   : > { %v319_v62 = vadd.f32 %v318_v61, %v317_v60 }
 0x1eb   : > { %v320_v63 = vrot.slane %v319_v62, 1 }
 0x1ed   : > { %v321_v0 = vadd.f32 %v320_v63, %v319_v62 }
 0x1ef   : > { %515 = vpush %v321_v0 }
 0x220   : > { %s516_s8 = spop %515 }
 0x221   : > { %v323_v2 = vstv %s516_s8 }
 0x222   : > { %v324_v3 = vadd.f32 %v323_v2, %v309_v1 }
 0x224   : > { %326 = vst.msk [vmem:[%s241_s4] sm:$0x1] %vm249_vm12, %v324_v3 }
 0x225 PF: > { %s14_s14 = sadd.s32 1, %s577_s14   ;;  %s677_s12 = smov %s573_s13 }
 0x226   : > { %p11_p8 = scmp.ge.s32.totalorder %s14_s14, 4   ;;  %s678_s13 = smov %s680_s15 }
 0x228   :  { %13 = sbr.rel (!%p11_p8) target bundleno = 2 (0x2), region = 77 }

// kernel: can_loss.3
= control target key start
LH: loop header
LB: loop body
LE: loop exit
PB: predicated region body
PF: predicated region fallthrough
CT: control target
= control target key end

     0   :  { %v29_v2 = vlaneseq  ;;  %s206_s0 = inlined_call_operand.vmem [shape: f32[2,2,111], index: 0, kind: input, shape index: {}]   ;;  %s207_s1 = inlined_call_operand.vmem [shape: f32[2,1,1], index: 1, kind: input, shape index: {}]   ;;  %s208_s2 = inlined_call_operand.vmem [shape: f32[2,111], index: 2, kind: input, shape index: {}]   ;;  %s209_s3 = inlined_call_operand.vmem [shape: f32[2,111], index: 3, kind: input, shape index: {}]   ;;  %s210_s4 = inlined_call_operand.vmem [shape: f32[2,111], index: 4, kind: input, shape index: {}]   ;;  %s211_s5 = inlined_call_operand.hbm [shape: f32[1,1], index: 5, kind: output, shape index: {}]  }
   0x1   :  { %v21_v0 = vld [vmem:[%s206_s0] sm:$0x3]  ;;  %v114_v1 = vld [vmem:[%s206_s0 + $0x2] sm:$0x3] }
   0x2   :  { %v25_v3 = vadd.f32 %v114_v1, %v21_v0  ;;  %v30_v4 = vand.u32 127, %v29_v2 }
   0x3   :  { %10 = vsyncpa [#allocation3], 0  ;;  %v75_v5 = vld [vmem:[%s208_s2] sm:$0x3]  ;;  %vm43_vm3 = vcmask 902144   ;;  %s148_s11 = smov [#allocation2]  }
   0x4   :  { %vm31_vm0 = vcmp.ge.s32.totalorder %v30_v4, 2  ;;  %vm32_vm1 = vcmp.le.s32.totalorder %v30_v4, 106  ;;  %v35_v6 = vld [vmem:[%s209_s3] sm:$0x3]  ;;  %s106_s12 = sshll.u32 %s148_s11, 4  ;;  %vm98_vm7 = vcmask 0   ;;  %s107_s12 = int_to_ptr.vmem [resolvable:$true] %s106_s12 }
   0x5   :  { %v55_v7 = vld [vmem:[%s210_s4] sm:$0x3]  ;;  %vm33_vm2 = vmand %vm31_vm0, %vm32_vm1  ;;  %s126_s13 = scalar_lea.vmem %s107_s12, 16  ;;  %s130_s14 = scalar_lea.vmem %s107_s12, 32 }
   0x6   :  { %v34_v8 = vsel %vm33_vm2, %v25_v3, 0.0  ;;  %v22_v51 = vld [vmem:[%s207_s1] sm:$0x1]  ;;  %v115_v52 = vld [vmem:[%s207_s1 + $0x1] sm:$0x1]  ;;  %p127_p0 = scmp.ne.s32.totalorder %s107_s12, %s126_s13  ;;  %p131_p1 = scmp.lt.s32.totalorder %s107_s12, %s107_s12 }
   0x7   :  { %v76_v9 = vsub.f32 %v75_v5, %v34_v8  ;;  %v36_v10 = vsub.f32 %v35_v6, %v34_v8  ;;  %v56_v11 = vsub.f32 %v55_v7, %v34_v8  ;;  %v28_v53 = vadd.f32 %v115_v52, %v22_v51  ;;  %p132_p2 = scmp.lt.s32.totalorder %s130_s14, %s126_s13 }
   0x9   :  { %v77_v12 = vand.u32 2147483647, %v76_v9  ;;  %v79_v13 = vmul.f32 0.5, %v76_v9  ;;  %v37_v14 = vand.u32 2147483647, %v36_v10  ;;  %v39_v15 = vmul.f32 0.5, %v36_v10  ;;  %p133_p3 = por %p132_p2, %p131_p1 }
   0xa   :  { %v57_v16 = vand.u32 2147483647, %v56_v11  ;;  %v59_v17 = vmul.f32 0.5, %v56_v11  ;;  %v95_v54 = vmul.f32 0.0625, %v28_v53 }
   0xb   :  { %vm78_vm4 = vcmp.lt.f32.partialorder %v77_v12, 1.0  ;;  %v80_v18 = vmul.f32 %v79_v13, %v76_v9  ;;  %v118_v19 = vadd.f32 -0.5, %v77_v12  ;;  %vm38_vm5 = vcmp.lt.f32.partialorder %v37_v14, 1.0  ;;  %p134_p4 = pnand %p133_p3, %p127_p0 }
   0xc   :  { %v40_v20 = vmul.f32 %v39_v15, %v36_v10  ;;  %v116_v21 = vadd.f32 -0.5, %v37_v14  ;;  %vm58_vm6 = vcmp.lt.f32.partialorder %v57_v16, 1.0  ;;  %v60_v22 = vmul.f32 %v59_v17, %v56_v11 }
   0xd   :  { %v82_v23 = vsel %vm78_vm4, %v80_v18, %v118_v19  ;;  %v117_v24 = vadd.f32 -0.5, %v57_v16 }
   0xe   :  { %v83_v25 = vsel %vm43_vm3, %v82_v23, 0.0  ;;  %v42_v26 = vsel %vm38_vm5, %v40_v20, %v116_v21 }
   0xf   :  { %84 = vadd.xlane.f32.xlu1 %v83_v25  ;;  %v44_v27 = vsel %vm43_vm3, %v42_v26, 0.0  ;;  %v62_v28 = vsel %vm58_vm6, %v60_v22, %v117_v24 }
  0x10   :  { %45 = vadd.xlane.f32.xlu0 %v44_v27  ;;  %v63_v29 = vsel %vm43_vm3, %v62_v28, 0.0 }
  0x14   :  { %64 = vadd.xlane.f32.xlu0 %v63_v29 }
  0x98   :  { %v85_v30 = vpop.xlane.xlu1 %84 }
  0x99   :  { %v86_v31 = vrot.slane %v85_v30, 4  ;;  %v46_v32 = vpop.xlane.xlu0 %45 }
  0x9a   :  { %v47_v33 = vrot.slane %v46_v32, 4 }
  0x9b   :  { %v87_v34 = vadd.f32 %v86_v31, %v85_v30 }
  0x9c   :  { %v48_v35 = vadd.f32 %v47_v33, %v46_v32 }
  0x9d   :  { %v88_v36 = vrot.slane %v87_v34, 2  ;;  %v65_v37 = vpop.xlane.xlu0 %64 }
  0x9e   :  { %v49_v38 = vrot.slane %v48_v35, 2  ;;  %v66_v39 = vrot.slane %v65_v37, 4 }
  0x9f   :  { %v89_v42 = vadd.f32 %v88_v36, %v87_v34 }
  0xa0   :  { %v67_v40 = vadd.f32 %v66_v39, %v65_v37  ;;  %v50_v41 = vadd.f32 %v49_v38, %v48_v35 }
  0xa1   :  { %v90_v47 = vrot.slane %v89_v42, 1 }
  0xa2   :  { %v68_v43 = vrot.slane %v67_v40, 2  ;;  %v51_v44 = vrot.slane %v50_v41, 1 }
  0xa3   :  { %v91_v50 = vadd.f32 %v90_v47, %v89_v42 }
  0xa4   :  { %v69_v45 = vadd.f32 %v68_v43, %v67_v40  ;;  %v52_v46 = vadd.f32 %v51_v44, %v50_v41 }
  0xa6   :  { %119 = vpush %v52_v46  ;;  %v70_v48 = vrot.slane %v69_v45, 1 }
  0xa8   :  { %v71_v49 = vadd.f32 %v70_v48, %v69_v45 }
  0xaa   :  { %121 = vpush %v71_v49 }
  0xab   :  { %123 = vpush %v91_v50 }
  0xd7   :  { %s120_s0 = spop %119 }
  0xd8   :  { %s54_s29 = smul.f32 0.0045045046, %s120_s0 }
  0xdb   :  { %s122_s30 = spop %121 }
  0xdc   :  { %s73_s6 = smul.f32 0.0045045046, %s122_s30  ;;  %s124_s7 = spop %123 }
  0xdd   :  { %s93_s9 = smul.f32 0.0045045046, %s124_s7 }
  0xde   :  { %s74_s8 = sadd.f32 %s73_s6, %s54_s29 }
  0xe0   :  { %s94_s10 = sadd.f32 %s93_s9, %s74_s8 }
  0xe2   :  { %v96_v55 = vstv %s94_s10 }
  0xe3   :  { %v97_v56 = vadd.f32 %v96_v55, %v95_v54 }
  0xe5   :  { %99 = vst.msk [vmem:[#allocation2] sm:$0x1] %vm98_vm7, %v97_v56 }
  0xe6   :  { %137 = shalt.err (!%p134_p4)
}
  0xe7   :  { %109 = dma.vmem_to_hbm [thread:$0]  %s107_s12, 16, %s211_s5, [#allocation3]  }
  0xe8   :  { %146 = dma.done.wait [#allocation3], 16  }
  0xe9   :  { %147 = vsyncadd [#allocation3], 4294967280 }
  0xea   :  { %113 = vsyncpa [#allocation3], 1 }

</bundles_post_ra>
